<compile_context>
chip_gen: v7x
topology: tpu7x:2x2x1
jax: 0.10.0
libtpu: 0.0.40
codegen_flags: <defaults>
</compile_context>

<pallas_src>
import functools
import math

import jax
import jax.numpy as jnp
from jax.experimental import pallas as pl
from jax.experimental.pallas import tpu as pltpu


def _head_kernel(x_ref, w_ref, b_ref, o_ref, *, na):
    # x_ref: (C, t)        one batch element, one spatial tile (lane-dense in t)
    # w_ref: (na, no, C)   resident weights, PyTorch row k = a*no + o
    # b_ref: (na, 1, no)   resident bias
    # o_ref: (na, t, no)   output tile, already in the final permuted layout
    x = x_ref[...]                                    # load once, reuse per anchor
    for a in range(na):                               # static, na is tiny (3)
        acc = jnp.dot(w_ref[a], x,
                      preferred_element_type=jnp.float32)        # (no, t) on MXU
        o_ref[a] = (acc.T + b_ref[a]).astype(o_ref.dtype)        # (t, no)


def yolo_level_conv(x_nchw, w_kc, b_k, na, *, max_tile=1024):
    """1x1 conv + bias + (0,1,3,4,2) permute, fused, operating on NCHW.

    x_nchw: (N, C, H, W);  w_kc: (na*no, C);  b_k: (na*no,)
    Returns y: (N, na, H, W, no)
    """
    n, c, h, w = x_nchw.shape
    k = w_kc.shape[0]
    assert k % na == 0
    no = k // na
    hw = h * w

    x3 = x_nchw.reshape(n, c, hw)          # free reshape, no transpose
    w3 = w_kc.reshape(na, no, c)           # free reshape (row k = a*no + o)
    b3 = b_k.reshape(na, 1, no)            # free reshape

    # Lane tile for the input / sublane tile for the output.
    t = hw if hw <= max_tile else max_tile
    grid = (n, pl.cdiv(hw, t))             # last block masked if hw % t != 0

    y = pl.pallas_call(
        functools.partial(_head_kernel, na=na),
        out_shape=jax.ShapeDtypeStruct((n, na, hw, no), x_nchw.dtype),
        grid_spec=pltpu.PrefetchScalarGridSpec(
            num_scalar_prefetch=0,
            grid=grid,
            in_specs=[
                pl.BlockSpec((None, c, t), lambda i, j: (i, 0, j)),
                pl.BlockSpec((na, no, c), lambda i, j: (0, 0, 0)),
                pl.BlockSpec((na, 1, no), lambda i, j: (0, 0, 0)),
            ],
            out_specs=pl.BlockSpec((None, na, t, no),
                                   lambda i, j: (i, 0, j, 0)),
        ),
        compiler_params=pltpu.CompilerParams(
            dimension_semantics=("parallel", "parallel")),
    )(x3, w3, b3)
    return y.reshape(n, na, h, w, no)      # free reshape (HW -> H, W)


class YoloHeadPallas:
    """JAX/Pallas re-implementation of YoloHead.forward (training path)."""

    def __init__(self, ch, nc, anchors, key):
        self.nc = nc
        self.no = nc + 5
        self.nl = len(anchors)
        assert self.nl == len(ch)
        self.na = len(anchors[0]) // 2
        # Buffers (unused in the training forward, kept for parity).
        self.anchors = jnp.asarray(anchors, dtype=jnp.float32).reshape(
            self.nl, -1, 2)
        self.anchor_grid = self.anchors.reshape(self.nl, 1, -1, 1, 1, 2)
        out_ch = self.no * self.na
        # Weights in PyTorch Conv2d layout (out_ch, in_ch); row k = a*no + o.
        self.weights = []
        self.biases = []
        for c in ch:
            kw, kb, key = jax.random.split(key, 3)
            bound = 1.0 / math.sqrt(c)
            w = jax.random.uniform(kw, (out_ch, c), jnp.float32, -bound, bound)
            b = jax.random.uniform(kb, (out_ch,), jnp.float32, -bound, bound)
            self.weights.append(w)
            self.biases.append(b)

    def __call__(self, xs):
        """xs: list of NCHW float32 tensors. Returns list of
        [N, na, Hi, Wi, no] tensors (same as the PyTorch forward)."""
        # TODO(synk): fuse the nl levels into a single pallas_call (needs
        # channel padding or a scalar-prefetched per-level offset table since
        # C differs per level); with three calls the smaller levels pay launch
        # overhead.
        outs = []
        for i in range(self.nl):
            outs.append(
                yolo_level_conv(xs[i], self.weights[i], self.biases[i],
                                self.na))
        return outs


if __name__ == "__main__":
    key = jax.random.PRNGKey(0)

    # Small, YOLO-like configuration: 3 FPN levels, 3 anchors/level, 3 classes.
    nc = 3
    anchors = [
        [10, 13, 16, 30, 33, 23],
        [30, 61, 62, 45, 59, 119],
        [116, 90, 156, 198, 373, 326],
    ]
    ch = [4, 8, 16]                 # input channels per level
    spatial = [(16, 16), (8, 8), (4, 4)]
    batch = 2

    k_head, k0, k1, k2 = jax.random.split(key, 4)
    head = YoloHeadPallas(ch, nc, anchors, k_head)

    xs = []
    for kx, c, (h, w) in zip((k0, k1, k2), ch, spatial):
        xs.append(jax.random.normal(kx, (batch, c, h, w), jnp.float32))

    outs = head(xs)
    outs = [jax.block_until_ready(o) for o in outs]

    # Sanity check against a plain-JAX reference of the same math.
    for i, (x, o) in enumerate(zip(xs, outs)):
        n, c, h, w = x.shape
        ref = jnp.einsum("nchw,kc->nkhw", x, head.weights[i])
        ref = ref + head.biases[i][None, :, None, None]
        ref = ref.reshape(n, head.na, head.no, h, w).transpose(0, 1, 3, 4, 2)
        assert o.shape == (n, head.na, h, w, head.no), o.shape
        assert jnp.allclose(o, ref, atol=1e-4, rtol=1e-4), (
            f"level {i} mismatch: max abs err "
            f"{float(jnp.max(jnp.abs(o - ref)))}")

    print("KERNEL_OK")
</pallas_src>

<mosaic_0001>
module attributes {stable_mosaic.version = 11 : i64} {
  func.func @_head_kernel(%arg0: i32, %arg1: i32, %arg2: memref<1x4x256xf32, #tpu.memory_space<vmem>>, %arg3: memref<3x8x4xf32, #tpu.memory_space<vmem>>, %arg4: memref<3x1x8xf32, #tpu.memory_space<vmem>>, %arg5: memref<1x3x256x8xf32, #tpu.memory_space<vmem>>) attributes {dimension_semantics = [#tpu.dimension_semantics<parallel>, #tpu.dimension_semantics<parallel>], iteration_bounds = array<i64: 2, 1>, scalar_prefetch = 0 : i64, scratch_operands = 0 : i64, tpu.core_type = #tpu.core_type<tc>, window_params = [{transform_indices = @transform_0, window_bounds = array<i64: 1, 4, 256>}, {pipeline_mode = #tpu.pipeline_mode<synchronous>, transform_indices = @transform_1, window_bounds = array<i64: 3, 8, 4>}, {pipeline_mode = #tpu.pipeline_mode<synchronous>, transform_indices = @transform_2, window_bounds = array<i64: 3, 1, 8>}, {transform_indices = @transform_3, window_bounds = array<i64: 1, 3, 256, 8>}]} {
    %c0 = arith.constant 0 : index
    %c0_0 = arith.constant 0 : index
    %c0_1 = arith.constant 0 : index
    %0 = vector.load %arg2[%c0, %c0_0, %c0_1] : memref<1x4x256xf32, #tpu.memory_space<vmem>>, vector<1x4x256xf32>
    %1 = vector.shape_cast %0 : vector<1x4x256xf32> to vector<4x256xf32>
    %c0_2 = arith.constant 0 : index
    %c0_3 = arith.constant 0 : index
    %c0_4 = arith.constant 0 : index
    %2 = vector.load %arg3[%c0_2, %c0_3, %c0_4] : memref<3x8x4xf32, #tpu.memory_space<vmem>>, vector<1x8x4xf32>
    %3 = vector.shape_cast %2 : vector<1x8x4xf32> to vector<8x4xf32>
    %cst = arith.constant dense<0.000000e+00> : vector<8x256xf32>
    %4 = tpu.matmul %3, %1, %cst {dimension_numbers = #tpu.dot_dimension_numbers<[1], [0], [0], [1], [0, 0, 1, 1], [], []>} : vector<8x4xf32>, vector<4x256xf32>, vector<8x256xf32> -> vector<8x256xf32>
    %5 = tpu.transpose %4, [1, 0] : vector<8x256xf32> -> vector<256x8xf32>
    %c0_5 = arith.constant 0 : index
    %c0_6 = arith.constant 0 : index
    %c0_7 = arith.constant 0 : index
    %6 = vector.load %arg4[%c0_5, %c0_6, %c0_7] : memref<3x1x8xf32, #tpu.memory_space<vmem>>, vector<1x1x8xf32>
    %7 = vector.shape_cast %6 : vector<1x1x8xf32> to vector<1x8xf32>
    %8 = vector.broadcast %7 : vector<1x8xf32> to vector<256x8xf32>
    %9 = arith.addf %5, %8 : vector<256x8xf32>
    %c0_8 = arith.constant 0 : index
    %c0_9 = arith.constant 0 : index
    %c0_10 = arith.constant 0 : index
    %c0_11 = arith.constant 0 : index
    %10 = vector.load %arg5[%c0_8, %c0_9, %c0_10, %c0_11] : memref<1x3x256x8xf32, #tpu.memory_space<vmem>>, vector<1x1x256x8xf32>
    %11 = vector.shape_cast %10 : vector<1x1x256x8xf32> to vector<256x8xf32>
    %12 = vector.shape_cast %9 : vector<256x8xf32> to vector<1x1x256x8xf32>
    tpu.vector_store %arg5[%c0_8, %c0_9, %c0_10, %c0_11], %12 {strides = array<i32>} : memref<1x3x256x8xf32, #tpu.memory_space<vmem>>, vector<1x1x256x8xf32>,
    %c1 = arith.constant 1 : index
    %c0_12 = arith.constant 0 : index
    %c0_13 = arith.constant 0 : index
    %13 = vector.load %arg3[%c1, %c0_12, %c0_13] : memref<3x8x4xf32, #tpu.memory_space<vmem>>, vector<1x8x4xf32>
    %14 = vector.shape_cast %13 : vector<1x8x4xf32> to vector<8x4xf32>
    %cst_14 = arith.constant dense<0.000000e+00> : vector<8x256xf32>
    %15 = tpu.matmul %14, %1, %cst_14 {dimension_numbers = #tpu.dot_dimension_numbers<[1], [0], [0], [1], [0, 0, 1, 1], [], []>} : vector<8x4xf32>, vector<4x256xf32>, vector<8x256xf32> -> vector<8x256xf32>
    %16 = tpu.transpose %15, [1, 0] : vector<8x256xf32> -> vector<256x8xf32>
    %c1_15 = arith.constant 1 : index
    %c0_16 = arith.constant 0 : index
    %c0_17 = arith.constant 0 : index
    %17 = vector.load %arg4[%c1_15, %c0_16, %c0_17] : memref<3x1x8xf32, #tpu.memory_space<vmem>>, vector<1x1x8xf32>
    %18 = vector.shape_cast %17 : vector<1x1x8xf32> to vector<1x8xf32>
    %19 = vector.broadcast %18 : vector<1x8xf32> to vector<256x8xf32>
    %20 = arith.addf %16, %19 : vector<256x8xf32>
    %c0_18 = arith.constant 0 : index
    %c1_19 = arith.constant 1 : index
    %c0_20 = arith.constant 0 : index
    %c0_21 = arith.constant 0 : index
    %21 = vector.load %arg5[%c0_18, %c1_19, %c0_20, %c0_21] : memref<1x3x256x8xf32, #tpu.memory_space<vmem>>, vector<1x1x256x8xf32>
    %22 = vector.shape_cast %21 : vector<1x1x256x8xf32> to vector<256x8xf32>
    %23 = vector.shape_cast %20 : vector<256x8xf32> to vector<1x1x256x8xf32>
    tpu.vector_store %arg5[%c0_18, %c1_19, %c0_20, %c0_21], %23 {strides = array<i32>} : memref<1x3x256x8xf32, #tpu.memory_space<vmem>>, vector<1x1x256x8xf32>,
    %c2 = arith.constant 2 : index
    %c0_22 = arith.constant 0 : index
    %c0_23 = arith.constant 0 : index
    %24 = vector.load %arg3[%c2, %c0_22, %c0_23] : memref<3x8x4xf32, #tpu.memory_space<vmem>>, vector<1x8x4xf32>
    %25 = vector.shape_cast %24 : vector<1x8x4xf32> to vector<8x4xf32>
    %cst_24 = arith.constant dense<0.000000e+00> : vector<8x256xf32>
    %26 = tpu.matmul %25, %1, %cst_24 {dimension_numbers = #tpu.dot_dimension_numbers<[1], [0], [0], [1], [0, 0, 1, 1], [], []>} : vector<8x4xf32>, vector<4x256xf32>, vector<8x256xf32> -> vector<8x256xf32>
    %27 = tpu.transpose %26, [1, 0] : vector<8x256xf32> -> vector<256x8xf32>
    %c2_25 = arith.constant 2 : index
    %c0_26 = arith.constant 0 : index
    %c0_27 = arith.constant 0 : index
    %28 = vector.load %arg4[%c2_25, %c0_26, %c0_27] : memref<3x1x8xf32, #tpu.memory_space<vmem>>, vector<1x1x8xf32>
    %29 = vector.shape_cast %28 : vector<1x1x8xf32> to vector<1x8xf32>
    %30 = vector.broadcast %29 : vector<1x8xf32> to vector<256x8xf32>
    %31 = arith.addf %27, %30 : vector<256x8xf32>
    %c0_28 = arith.constant 0 : index
    %c2_29 = arith.constant 2 : index
    %c0_30 = arith.constant 0 : index
    %c0_31 = arith.constant 0 : index
    %32 = vector.load %arg5[%c0_28, %c2_29, %c0_30, %c0_31] : memref<1x3x256x8xf32, #tpu.memory_space<vmem>>, vector<1x1x256x8xf32>
    %33 = vector.shape_cast %32 : vector<1x1x256x8xf32> to vector<256x8xf32>
    %34 = vector.shape_cast %31 : vector<256x8xf32> to vector<1x1x256x8xf32>
    tpu.vector_store %arg5[%c0_28, %c2_29, %c0_30, %c0_31], %34 {strides = array<i32>} : memref<1x3x256x8xf32, #tpu.memory_space<vmem>>, vector<1x1x256x8xf32>,
    return
  }
  func.func @transform_0(%arg0: i32, %arg1: i32) -> (i32, i32, i32) {
    %c0_i32 = arith.constant 0 : i32
    %c0_i32_0 = arith.constant 0 : i32
    return %arg0, %c0_i32, %arg1 : i32, i32, i32
  }
  func.func @transform_1(%arg0: i32, %arg1: i32) -> (i32, i32, i32) {
    %c0_i32 = arith.constant 0 : i32
    %c0_i32_0 = arith.constant 0 : i32
    %c0_i32_1 = arith.constant 0 : i32
    %c0_i32_2 = arith.constant 0 : i32
    return %c0_i32, %c0_i32_0, %c0_i32_1 : i32, i32, i32
  }
  func.func @transform_2(%arg0: i32, %arg1: i32) -> (i32, i32, i32) {
    %c0_i32 = arith.constant 0 : i32
    %c0_i32_0 = arith.constant 0 : i32
    %c0_i32_1 = arith.constant 0 : i32
    %c0_i32_2 = arith.constant 0 : i32
    return %c0_i32, %c0_i32_0, %c0_i32_1 : i32, i32, i32
  }
  func.func @transform_3(%arg0: i32, %arg1: i32) -> (i32, i32, i32, i32) {
    %c0_i32 = arith.constant 0 : i32
    %c0_i32_0 = arith.constant 0 : i32
    %c0_i32_1 = arith.constant 0 : i32
    return %arg0, %c0_i32, %arg1, %c0_i32_0 : i32, i32, i32, i32
  }
}

</mosaic_0001>

<bundles_post_ra>
// kernel: tpu_custom_call.1
= control target key start
LH: loop header
LB: loop body
LE: loop exit
PB: predicated region body
PF: predicated region fallthrough
CT: control target
= control target key end

     0   :  { %s1106_s12 = smov 0   ;;  %s1108_s13 = smov 0   ;;  %s1457_s0 = inlined_call_operand.vmem [shape: f32[2,4,256], index: 0, kind: input, shape index: {}]   ;;  %s1458_s1 = inlined_call_operand.vmem [shape: f32[3,8,4], index: 1, kind: input, shape index: {}]   ;;  %s1459_s2 = inlined_call_operand.vmem [shape: f32[3,1,8], index: 2, kind: input, shape index: {}]   ;;  %s1460_s3 = inlined_call_operand.vmem [shape: f32[2,3,256,8], index: 3, kind: output, shape index: {}]  }
   0x1   :  { %s1110_s14 = smov 0  }
   0x2 LB: > { %s25_s15 = sadd.s32 1, %s1079_s13  ;;  %p947_p0 = scmp.ge.s32.totalorder %s1083_s14, 1  ;;  %s1083_s14 = sphi %s1110_s14, %s13_s14   ;;  %s1079_s13 = sphi %s1108_s13, %s1462_s13   ;;  %s1075_s12 = sphi %s1106_s12, %s1461_s12  }
   0x3   : > { %p27_p1 = scmp.ge.s32.totalorder %s25_s15, 2  ;;  %p158_p2 = scmp.lt.s32.totalorder %s1083_s14, 3 }
   0x5   : > { %s1464_s15 = smov (%p27_p1, %s25_s15), 0  ;;  %p159_p3 = pnand %p947_p0, %p158_p2 }
   0x6   : > { %p191_p4 = scmp.lt.s32.totalorder (!%p159_p3), %s1075_s12, 1  ;;  %v1085_v0 = vmov (!%p159_p3), 0.0   ;;  %vm218_vm0 = vcmask (!%p159_p3), 1043456   ;;  %v211_v3 = vld [vmem:[%s1458_s1] sm:$0xff] (!%p159_p3)  ;;  %vm214_vm1 = vcmask (!%p159_p3), 31744   ;;  %v955_v4 = vld [vmem:[%s1458_s1 + $0x8] sm:$0xff] (!%p159_p3) }
   0x7   : > { %162 = sbr.rel (%p159_p3) target bundleno = 554 (0x22a), region = 32  ;;  %287 = vmatprep.mubr.f32.mxu0 (!%p159_p3), %v1085_v0  ;;  %499 = vmatprep.mubr.f32.mxu1 (!%p159_p3), %v1085_v0  ;;  %v993_v5 = vld [vmem:[%s1458_s1 + $0x10] sm:$0xff] (!%p159_p3)  ;;  %v1143_v12 = vld [vmem:[%s1459_s2 + $0x1] ss:$0 sm:$0xff] (!%p159_p3)  ;;  %v1148_v13 = vld [vmem:[%s1459_s2] ss:$0 sm:$0xff] (!%p159_p3) }
   0x8   : > { %vm397_vm2 = vcmask (!%p159_p3), 64512  }
   0xe   : > { %s1466_s12 = smov (!%p191_p4, %s1075_s12), 1 }
   0xf   : > { %s1033_s16 = sshll.u32 %s1466_s12, 3  ;;  %s1034_s26 = smul.u32 768, %s1466_s12 }
  0x10   : > { %s198_s19 = scalar_lea.vmem %s1457_s0, %s1033_s16 }
  0x11   : > { %v210_v1 = vld [vmem:[%s198_s19] sm:$0xff]  ;;  %s1153_s6 = scalar_lea.vmem %s1460_s3, %s1034_s26 }
  0x12   : > { %v213_v2 = vcombine.high %v210_v1, %v210_v1 }
  0x14   : > { %951 = vmatprep.subr.msk.mxu0 %vm218_vm0, %v213_v2  ;;  %956 = vmatprep.subr.msk.mxu1 %vm218_vm0, %v213_v2 }
  0x15   : > { %952 = vmatpush1.msk.msra.mxu0 %vm218_vm0, %v210_v1  ;;  %957 = vmatpush1.msk.msra.mxu1 %vm218_vm0, %v210_v1 }
  0x16   : > { %953 = vmatmul.mubr.msk.f32.vlgmr.msra.gmra.mrb[0].mxu0 %vm214_vm1, %v211_v3  ;;  %958 = vmatmul.mubr.msk.f32.vlgmr.msra.gmra.mrb[0].mxu1 %vm214_vm1, %v955_v4 }
  0x17   : > { %994 = vmatprep.subr.msk.mxu0 %vm218_vm0, %v213_v2  ;;  %712 = vmatprep.mubr.f32.mxu0 %v1085_v0 }
  0x18   : > { %995 = vmatpush1.msk.msra.mxu0 %vm218_vm0, %v210_v1 }
  0x1a   : > { %996 = vmatmul.mubr.msk.f32.vlgmr.msra.gmra.mrb[2].mxu0 %vm214_vm1, %v993_v5 }
  0xe9   : > { %v289_v6 = vpop.f32.mrb[0].mxu0  ;;  %v501_v7 = vpop.f32.mrb[0].mxu1 }
  0xea   : > { %506 = vxpose.xlu1.b32.start.end [1/1] (short) %v501_v7, 128  ;;  %v503_v8 = vpop.f32.mrb[1].mxu1  ;;  %294 = vxpose.xlu0.b32.start.end [1/1] (short) %v289_v6, 128  ;;  %v291_v9 = vpop.f32.mrb[1].mxu0 }
  0xed   : > { %v714_v10 = vpop.f32.mrb[2].mxu0 }
  0xee   : > { %v716_v11 = vpop.f32.mrb[3].mxu0 }
 0x127   : > { %538 = vxpose.xlu1.b32.start.end [1/1] (short) %v503_v8, 128  ;;  %326 = vxpose.xlu0.b32.start.end [1/1] (short) %v291_v9, 128 }
 0x164   : > { %719 = vxpose.xlu0.b32.start.end [1/1] (short) %v714_v10, 128  ;;  %751 = vxpose.xlu1.b32.start.end [1/1] (short) %v716_v11, 128 }
 0x16a   : > { %v522_v14 = vpop.trf.xlu1  ;;  %v310_v15 = vpop.trf.xlu0 }
 0x16b   : > { %v578_v16 = vadd.f32 %v1143_v12, %v522_v14  ;;  %v365_v17 = vadd.f32 %v1148_v13, %v310_v15 }
 0x16d   : > { %961 = vst.msk [vmem:[%s1153_s6 + $0x100] sm:$0xff] %vm397_vm2, %v578_v16  ;;  %398 = vst.msk [vmem:[%s1153_s6] sm:$0xff] %vm397_vm2, %v365_v17 }
 0x16e   : > { %v523_v18 = vpop.trf.xlu1  ;;  %v311_v19 = vpop.trf.xlu0 }
 0x16f   : > { %v579_v20 = vadd.f32 %v1143_v12, %v523_v18  ;;  %v366_v21 = vadd.f32 %v1148_v13, %v311_v19 }
 0x171   : > { %962 = vst.msk [vmem:[%s1153_s6 + $0x108] sm:$0xff] %vm397_vm2, %v579_v20  ;;  %399 = vst.msk [vmem:[%s1153_s6 + $0x8] sm:$0xff] %vm397_vm2, %v366_v21 }
 0x172   : > { %v524_v22 = vpop.trf.xlu1  ;;  %v312_v23 = vpop.trf.xlu0 }
 0x173   : > { %v580_v24 = vadd.f32 %v1143_v12, %v524_v22  ;;  %v367_v25 = vadd.f32 %v1148_v13, %v312_v23 }
 0x175   : > { %963 = vst.msk [vmem:[%s1153_s6 + $0x110] sm:$0xff] %vm397_vm2, %v580_v24  ;;  %400 = vst.msk [vmem:[%s1153_s6 + $0x10] sm:$0xff] %vm397_vm2, %v367_v25 }
 0x176   : > { %v525_v26 = vpop.trf.xlu1  ;;  %v313_v27 = vpop.trf.xlu0 }
 0x177   : > { %v581_v28 = vadd.f32 %v1143_v12, %v525_v26  ;;  %v368_v29 = vadd.f32 %v1148_v13, %v313_v27 }
 0x179   : > { %964 = vst.msk [vmem:[%s1153_s6 + $0x118] sm:$0xff] %vm397_vm2, %v581_v28  ;;  %401 = vst.msk [vmem:[%s1153_s6 + $0x18] sm:$0xff] %vm397_vm2, %v368_v29 }
 0x17a   : > { %v526_v30 = vpop.trf.xlu1  ;;  %v314_v31 = vpop.trf.xlu0 }
 0x17b   : > { %v582_v32 = vadd.f32 %v1143_v12, %v526_v30  ;;  %v369_v33 = vadd.f32 %v1148_v13, %v314_v31 }
 0x17d   : > { %965 = vst.msk [vmem:[%s1153_s6 + $0x120] sm:$0xff] %vm397_vm2, %v582_v32  ;;  %402 = vst.msk [vmem:[%s1153_s6 + $0x20] sm:$0xff] %vm397_vm2, %v369_v33 }
 0x17e   : > { %v527_v34 = vpop.trf.xlu1  ;;  %v315_v35 = vpop.trf.xlu0 }
 0x17f   : > { %v583_v36 = vadd.f32 %v1143_v12, %v527_v34  ;;  %v370_v37 = vadd.f32 %v1148_v13, %v315_v35 }
 0x181   : > { %966 = vst.msk [vmem:[%s1153_s6 + $0x128] sm:$0xff] %vm397_vm2, %v583_v36  ;;  %403 = vst.msk [vmem:[%s1153_s6 + $0x28] sm:$0xff] %vm397_vm2, %v370_v37 }
 0x182   : > { %v528_v38 = vpop.trf.xlu1  ;;  %v316_v39 = vpop.trf.xlu0 }
 0x183   : > { %v584_v40 = vadd.f32 %v1143_v12, %v528_v38  ;;  %v371_v41 = vadd.f32 %v1148_v13, %v316_v39 }
 0x185   : > { %967 = vst.msk [vmem:[%s1153_s6 + $0x130] sm:$0xff] %vm397_vm2, %v584_v40  ;;  %404 = vst.msk [vmem:[%s1153_s6 + $0x30] sm:$0xff] %vm397_vm2, %v371_v41 }
 0x186   : > { %v529_v42 = vpop.trf.xlu1  ;;  %v317_v43 = vpop.trf.xlu0 }
 0x187   : > { %v585_v44 = vadd.f32 %v1143_v12, %v529_v42  ;;  %v372_v45 = vadd.f32 %v1148_v13, %v317_v43 }
 0x189   : > { %968 = vst.msk [vmem:[%s1153_s6 + $0x138] sm:$0xff] %vm397_vm2, %v585_v44  ;;  %405 = vst.msk [vmem:[%s1153_s6 + $0x38] sm:$0xff] %vm397_vm2, %v372_v45 }
 0x18a   : > { %v530_v46 = vpop.trf.xlu1  ;;  %v318_v47 = vpop.trf.xlu0 }
 0x18b   : > { %v586_v48 = vadd.f32 %v1143_v12, %v530_v46  ;;  %v373_v49 = vadd.f32 %v1148_v13, %v318_v47 }
 0x18d   : > { %969 = vst.msk [vmem:[%s1153_s6 + $0x140] sm:$0xff] %vm397_vm2, %v586_v48  ;;  %406 = vst.msk [vmem:[%s1153_s6 + $0x40] sm:$0xff] %vm397_vm2, %v373_v49 }
 0x18e   : > { %v531_v50 = vpop.trf.xlu1  ;;  %v319_v51 = vpop.trf.xlu0 }
 0x18f   : > { %v587_v52 = vadd.f32 %v1143_v12, %v531_v50  ;;  %v374_v53 = vadd.f32 %v1148_v13, %v319_v51 }
 0x191   : > { %970 = vst.msk [vmem:[%s1153_s6 + $0x148] sm:$0xff] %vm397_vm2, %v587_v52  ;;  %407 = vst.msk [vmem:[%s1153_s6 + $0x48] sm:$0xff] %vm397_vm2, %v374_v53 }
 0x192   : > { %v532_v54 = vpop.trf.xlu1  ;;  %v320_v55 = vpop.trf.xlu0 }
 0x193   : > { %v588_v56 = vadd.f32 %v1143_v12, %v532_v54  ;;  %v375_v57 = vadd.f32 %v1148_v13, %v320_v55 }
 0x195   : > { %971 = vst.msk [vmem:[%s1153_s6 + $0x150] sm:$0xff] %vm397_vm2, %v588_v56  ;;  %408 = vst.msk [vmem:[%s1153_s6 + $0x50] sm:$0xff] %vm397_vm2, %v375_v57 }
 0x196   : > { %v533_v58 = vpop.trf.xlu1  ;;  %v321_v59 = vpop.trf.xlu0 }
 0x197   : > { %v589_v60 = vadd.f32 %v1143_v12, %v533_v58  ;;  %v376_v61 = vadd.f32 %v1148_v13, %v321_v59 }
 0x199   : > { %972 = vst.msk [vmem:[%s1153_s6 + $0x158] sm:$0xff] %vm397_vm2, %v589_v60  ;;  %409 = vst.msk [vmem:[%s1153_s6 + $0x58] sm:$0xff] %vm397_vm2, %v376_v61 }
 0x19a   : > { %v534_v62 = vpop.trf.xlu1  ;;  %v322_v63 = vpop.trf.xlu0 }
 0x19b   : > { %v590_v0 = vadd.f32 %v1143_v12, %v534_v62  ;;  %v377_v1 = vadd.f32 %v1148_v13, %v322_v63 }
 0x19d   : > { %973 = vst.msk [vmem:[%s1153_s6 + $0x160] sm:$0xff] %vm397_vm2, %v590_v0  ;;  %410 = vst.msk [vmem:[%s1153_s6 + $0x60] sm:$0xff] %vm397_vm2, %v377_v1 }
 0x19e   : > { %v535_v2 = vpop.trf.xlu1  ;;  %v323_v3 = vpop.trf.xlu0 }
 0x19f   : > { %v591_v4 = vadd.f32 %v1143_v12, %v535_v2  ;;  %v378_v5 = vadd.f32 %v1148_v13, %v323_v3 }
 0x1a1   : > { %974 = vst.msk [vmem:[%s1153_s6 + $0x168] sm:$0xff] %vm397_vm2, %v591_v4  ;;  %411 = vst.msk [vmem:[%s1153_s6 + $0x68] sm:$0xff] %vm397_vm2, %v378_v5 }
 0x1a2   : > { %v536_v6 = vpop.trf.xlu1  ;;  %v324_v7 = vpop.trf.xlu0 }
 0x1a3   : > { %v592_v8 = vadd.f32 %v1143_v12, %v536_v6  ;;  %v379_v9 = vadd.f32 %v1148_v13, %v324_v7 }
 0x1a5   : > { %975 = vst.msk [vmem:[%s1153_s6 + $0x170] sm:$0xff] %vm397_vm2, %v592_v8  ;;  %412 = vst.msk [vmem:[%s1153_s6 + $0x70] sm:$0xff] %vm397_vm2, %v379_v9 }
 0x1a6   : > { %v537_v10 = vpop.trf.xlu1  ;;  %v325_v11 = vpop.trf.xlu0 }
 0x1a7   : > { %v593_v14 = vadd.f32 %v1143_v12, %v537_v10  ;;  %v380_v15 = vadd.f32 %v1148_v13, %v325_v11 }
 0x1a9   : > { %976 = vst.msk [vmem:[%s1153_s6 + $0x178] sm:$0xff] %vm397_vm2, %v593_v14  ;;  %413 = vst.msk [vmem:[%s1153_s6 + $0x78] sm:$0xff] %vm397_vm2, %v380_v15 }
 0x1aa   : > { %v554_v16 = vpop.trf.xlu1  ;;  %v342_v17 = vpop.trf.xlu0 }
 0x1ab   : > { %v594_v18 = vadd.f32 %v1143_v12, %v554_v16  ;;  %v381_v19 = vadd.f32 %v1148_v13, %v342_v17 }
 0x1ad   : > { %977 = vst.msk [vmem:[%s1153_s6 + $0x180] sm:$0xff] %vm397_vm2, %v594_v18  ;;  %414 = vst.msk [vmem:[%s1153_s6 + $0x80] sm:$0xff] %vm397_vm2, %v381_v19  ;;  %v1346_v18 = vld [vmem:[%s1459_s2 + $0x2] ss:$0 sm:$0xff] }
 0x1ae   : > { %v555_v20 = vpop.trf.xlu1  ;;  %v343_v21 = vpop.trf.xlu0 }
 0x1af   : > { %v595_v22 = vadd.f32 %v1143_v12, %v555_v20  ;;  %v382_v23 = vadd.f32 %v1148_v13, %v343_v21 }
 0x1b1   : > { %978 = vst.msk [vmem:[%s1153_s6 + $0x188] sm:$0xff] %vm397_vm2, %v595_v22  ;;  %415 = vst.msk [vmem:[%s1153_s6 + $0x88] sm:$0xff] %vm397_vm2, %v382_v23 }
 0x1b2   : > { %v556_v24 = vpop.trf.xlu1  ;;  %v344_v25 = vpop.trf.xlu0 }
 0x1b3   : > { %v596_v26 = vadd.f32 %v1143_v12, %v556_v24  ;;  %v383_v27 = vadd.f32 %v1148_v13, %v344_v25 }
 0x1b5   : > { %979 = vst.msk [vmem:[%s1153_s6 + $0x190] sm:$0xff] %vm397_vm2, %v596_v26  ;;  %416 = vst.msk [vmem:[%s1153_s6 + $0x90] sm:$0xff] %vm397_vm2, %v383_v27 }
 0x1b6   : > { %v557_v28 = vpop.trf.xlu1  ;;  %v345_v29 = vpop.trf.xlu0 }
 0x1b7   : > { %v597_v30 = vadd.f32 %v1143_v12, %v557_v28  ;;  %v384_v31 = vadd.f32 %v1148_v13, %v345_v29 }
 0x1b9   : > { %980 = vst.msk [vmem:[%s1153_s6 + $0x198] sm:$0xff] %vm397_vm2, %v597_v30  ;;  %417 = vst.msk [vmem:[%s1153_s6 + $0x98] sm:$0xff] %vm397_vm2, %v384_v31 }
 0x1ba   : > { %v558_v32 = vpop.trf.xlu1  ;;  %v346_v33 = vpop.trf.xlu0 }
 0x1bb   : > { %v598_v34 = vadd.f32 %v1143_v12, %v558_v32  ;;  %v385_v35 = vadd.f32 %v1148_v13, %v346_v33 }
 0x1bd   : > { %981 = vst.msk [vmem:[%s1153_s6 + $0x1a0] sm:$0xff] %vm397_vm2, %v598_v34  ;;  %418 = vst.msk [vmem:[%s1153_s6 + $0xa0] sm:$0xff] %vm397_vm2, %v385_v35 }
 0x1be   : > { %v559_v36 = vpop.trf.xlu1  ;;  %v347_v37 = vpop.trf.xlu0 }
 0x1bf   : > { %v599_v38 = vadd.f32 %v1143_v12, %v559_v36  ;;  %v386_v39 = vadd.f32 %v1148_v13, %v347_v37 }
 0x1c1   : > { %982 = vst.msk [vmem:[%s1153_s6 + $0x1a8] sm:$0xff] %vm397_vm2, %v599_v38  ;;  %419 = vst.msk [vmem:[%s1153_s6 + $0xa8] sm:$0xff] %vm397_vm2, %v386_v39 }
 0x1c2   : > { %v560_v40 = vpop.trf.xlu1  ;;  %v348_v41 = vpop.trf.xlu0 }
 0x1c3   : > { %v600_v42 = vadd.f32 %v1143_v12, %v560_v40  ;;  %v387_v43 = vadd.f32 %v1148_v13, %v348_v41 }
 0x1c5   : > { %983 = vst.msk [vmem:[%s1153_s6 + $0x1b0] sm:$0xff] %vm397_vm2, %v600_v42  ;;  %420 = vst.msk [vmem:[%s1153_s6 + $0xb0] sm:$0xff] %vm397_vm2, %v387_v43 }
 0x1c6   : > { %v561_v44 = vpop.trf.xlu1  ;;  %v349_v45 = vpop.trf.xlu0 }
 0x1c7   : > { %v601_v46 = vadd.f32 %v1143_v12, %v561_v44  ;;  %v388_v47 = vadd.f32 %v1148_v13, %v349_v45 }
 0x1c9   : > { %984 = vst.msk [vmem:[%s1153_s6 + $0x1b8] sm:$0xff] %vm397_vm2, %v601_v46  ;;  %421 = vst.msk [vmem:[%s1153_s6 + $0xb8] sm:$0xff] %vm397_vm2, %v388_v47 }
 0x1ca   : > { %v562_v48 = vpop.trf.xlu1  ;;  %v350_v49 = vpop.trf.xlu0 }
 0x1cb   : > { %v602_v50 = vadd.f32 %v1143_v12, %v562_v48  ;;  %v389_v51 = vadd.f32 %v1148_v13, %v350_v49 }
 0x1cd   : > { %985 = vst.msk [vmem:[%s1153_s6 + $0x1c0] sm:$0xff] %vm397_vm2, %v602_v50  ;;  %422 = vst.msk [vmem:[%s1153_s6 + $0xc0] sm:$0xff] %vm397_vm2, %v389_v51 }
 0x1ce   : > { %v563_v52 = vpop.trf.xlu1  ;;  %v351_v53 = vpop.trf.xlu0 }
 0x1cf   : > { %v603_v54 = vadd.f32 %v1143_v12, %v563_v52  ;;  %v390_v55 = vadd.f32 %v1148_v13, %v351_v53 }
 0x1d1   : > { %986 = vst.msk [vmem:[%s1153_s6 + $0x1c8] sm:$0xff] %vm397_vm2, %v603_v54  ;;  %423 = vst.msk [vmem:[%s1153_s6 + $0xc8] sm:$0xff] %vm397_vm2, %v390_v55 }
 0x1d2   : > { %v564_v56 = vpop.trf.xlu1  ;;  %v352_v57 = vpop.trf.xlu0 }
 0x1d3   : > { %v604_v58 = vadd.f32 %v1143_v12, %v564_v56  ;;  %v391_v59 = vadd.f32 %v1148_v13, %v352_v57 }
 0x1d5   : > { %987 = vst.msk [vmem:[%s1153_s6 + $0x1d0] sm:$0xff] %vm397_vm2, %v604_v58  ;;  %424 = vst.msk [vmem:[%s1153_s6 + $0xd0] sm:$0xff] %vm397_vm2, %v391_v59 }
 0x1d6   : > { %v565_v60 = vpop.trf.xlu1  ;;  %v353_v61 = vpop.trf.xlu0 }
 0x1d7   : > { %v605_v62 = vadd.f32 %v1143_v12, %v565_v60  ;;  %v392_v63 = vadd.f32 %v1148_v13, %v353_v61 }
 0x1d9   : > { %988 = vst.msk [vmem:[%s1153_s6 + $0x1d8] sm:$0xff] %vm397_vm2, %v605_v62  ;;  %425 = vst.msk [vmem:[%s1153_s6 + $0xd8] sm:$0xff] %vm397_vm2, %v392_v63 }
 0x1da   : > { %v566_v0 = vpop.trf.xlu1  ;;  %v354_v1 = vpop.trf.xlu0 }
 0x1db   : > { %v606_v2 = vadd.f32 %v1143_v12, %v566_v0  ;;  %v393_v3 = vadd.f32 %v1148_v13, %v354_v1 }
 0x1dd   : > { %989 = vst.msk [vmem:[%s1153_s6 + $0x1e0] sm:$0xff] %vm397_vm2, %v606_v2  ;;  %426 = vst.msk [vmem:[%s1153_s6 + $0xe0] sm:$0xff] %vm397_vm2, %v393_v3 }
 0x1de   : > { %v567_v4 = vpop.trf.xlu1  ;;  %v355_v5 = vpop.trf.xlu0 }
 0x1df   : > { %v607_v6 = vadd.f32 %v1143_v12, %v567_v4  ;;  %v394_v7 = vadd.f32 %v1148_v13, %v355_v5 }
 0x1e1   : > { %990 = vst.msk [vmem:[%s1153_s6 + $0x1e8] sm:$0xff] %vm397_vm2, %v607_v6  ;;  %427 = vst.msk [vmem:[%s1153_s6 + $0xe8] sm:$0xff] %vm397_vm2, %v394_v7 }
 0x1e2   : > { %v568_v8 = vpop.trf.xlu1  ;;  %v356_v9 = vpop.trf.xlu0 }
 0x1e3   : > { %v608_v10 = vadd.f32 %v1143_v12, %v568_v8  ;;  %v395_v11 = vadd.f32 %v1148_v13, %v356_v9 }
 0x1e5   : > { %991 = vst.msk [vmem:[%s1153_s6 + $0x1f0] sm:$0xff] %vm397_vm2, %v608_v10  ;;  %428 = vst.msk [vmem:[%s1153_s6 + $0xf0] sm:$0xff] %vm397_vm2, %v395_v11 }
 0x1e6   : > { %v569_v14 = vpop.trf.xlu1  ;;  %v357_v15 = vpop.trf.xlu0 }
 0x1e7   : > { %v609_v16 = vadd.f32 %v1143_v12, %v569_v14  ;;  %v396_v17 = vadd.f32 %v1148_v13, %v357_v15 }
 0x1e9   : > { %992 = vst.msk [vmem:[%s1153_s6 + $0x1f8] sm:$0xff] %vm397_vm2, %v609_v16  ;;  %429 = vst.msk [vmem:[%s1153_s6 + $0xf8] sm:$0xff] %vm397_vm2, %v396_v17 }
 0x1ea   : > { %v735_v19 = vpop.trf.xlu0  ;;  %v767_v20 = vpop.trf.xlu1 }
 0x1eb   : > { %v791_v21 = vadd.f32 %v1346_v18, %v735_v19  ;;  %v807_v12 = vadd.f32 %v1346_v18, %v767_v20 }
 0x1ed   : > { %999 = vst.msk [vmem:[%s1153_s6 + $0x200] sm:$0xff] %vm397_vm2, %v791_v21  ;;  %1015 = vst.msk [vmem:[%s1153_s6 + $0x280] sm:$0xff] %vm397_vm2, %v807_v12 }
 0x1ee   : > { %v736_v13 = vpop.trf.xlu0  ;;  %v768_v22 = vpop.trf.xlu1 }
 0x1ef   : > { %v792_v23 = vadd.f32 %v1346_v18, %v736_v13  ;;  %v808_v24 = vadd.f32 %v1346_v18, %v768_v22 }
 0x1f1   : > { %1000 = vst.msk [vmem:[%s1153_s6 + $0x208] sm:$0xff] %vm397_vm2, %v792_v23  ;;  %1016 = vst.msk [vmem:[%s1153_s6 + $0x288] sm:$0xff] %vm397_vm2, %v808_v24 }
 0x1f2   : > { %v737_v25 = vpop.trf.xlu0  ;;  %v769_v26 = vpop.trf.xlu1 }
 0x1f3   : > { %v793_v27 = vadd.f32 %v1346_v18, %v737_v25  ;;  %v809_v28 = vadd.f32 %v1346_v18, %v769_v26 }
 0x1f5   : > { %1001 = vst.msk [vmem:[%s1153_s6 + $0x210] sm:$0xff] %vm397_vm2, %v793_v27  ;;  %1017 = vst.msk [vmem:[%s1153_s6 + $0x290] sm:$0xff] %vm397_vm2, %v809_v28 }
 0x1f6   : > { %v738_v29 = vpop.trf.xlu0  ;;  %v770_v30 = vpop.trf.xlu1 }
 0x1f7   : > { %v794_v31 = vadd.f32 %v1346_v18, %v738_v29  ;;  %v810_v32 = vadd.f32 %v1346_v18, %v770_v30 }
 0x1f9   : > { %1002 = vst.msk [vmem:[%s1153_s6 + $0x218] sm:$0xff] %vm397_vm2, %v794_v31  ;;  %1018 = vst.msk [vmem:[%s1153_s6 + $0x298] sm:$0xff] %vm397_vm2, %v810_v32 }
 0x1fa   : > { %v739_v33 = vpop.trf.xlu0  ;;  %v771_v34 = vpop.trf.xlu1 }
 0x1fb   : > { %v795_v35 = vadd.f32 %v1346_v18, %v739_v33  ;;  %v811_v36 = vadd.f32 %v1346_v18, %v771_v34 }
 0x1fd   : > { %1003 = vst.msk [vmem:[%s1153_s6 + $0x220] sm:$0xff] %vm397_vm2, %v795_v35  ;;  %1019 = vst.msk [vmem:[%s1153_s6 + $0x2a0] sm:$0xff] %vm397_vm2, %v811_v36 }
 0x1fe   : > { %v740_v37 = vpop.trf.xlu0  ;;  %v772_v38 = vpop.trf.xlu1 }
 0x1ff   : > { %v796_v39 = vadd.f32 %v1346_v18, %v740_v37  ;;  %v812_v40 = vadd.f32 %v1346_v18, %v772_v38 }
 0x201   : > { %1004 = vst.msk [vmem:[%s1153_s6 + $0x228] sm:$0xff] %vm397_vm2, %v796_v39  ;;  %1020 = vst.msk [vmem:[%s1153_s6 + $0x2a8] sm:$0xff] %vm397_vm2, %v812_v40 }
 0x202   : > { %v741_v41 = vpop.trf.xlu0  ;;  %v773_v42 = vpop.trf.xlu1 }
 0x203   : > { %v797_v43 = vadd.f32 %v1346_v18, %v741_v41  ;;  %v813_v44 = vadd.f32 %v1346_v18, %v773_v42 }
 0x205   : > { %1005 = vst.msk [vmem:[%s1153_s6 + $0x230] sm:$0xff] %vm397_vm2, %v797_v43  ;;  %1021 = vst.msk [vmem:[%s1153_s6 + $0x2b0] sm:$0xff] %vm397_vm2, %v813_v44 }
 0x206   : > { %v742_v45 = vpop.trf.xlu0  ;;  %v774_v46 = vpop.trf.xlu1 }
 0x207   : > { %v798_v47 = vadd.f32 %v1346_v18, %v742_v45  ;;  %v814_v48 = vadd.f32 %v1346_v18, %v774_v46 }
 0x209   : > { %1006 = vst.msk [vmem:[%s1153_s6 + $0x238] sm:$0xff] %vm397_vm2, %v798_v47  ;;  %1022 = vst.msk [vmem:[%s1153_s6 + $0x2b8] sm:$0xff] %vm397_vm2, %v814_v48 }
 0x20a   : > { %v743_v49 = vpop.trf.xlu0  ;;  %v775_v50 = vpop.trf.xlu1 }
 0x20b   : > { %v799_v51 = vadd.f32 %v1346_v18, %v743_v49  ;;  %v815_v52 = vadd.f32 %v1346_v18, %v775_v50 }
 0x20d   : > { %1007 = vst.msk [vmem:[%s1153_s6 + $0x240] sm:$0xff] %vm397_vm2, %v799_v51  ;;  %1023 = vst.msk [vmem:[%s1153_s6 + $0x2c0] sm:$0xff] %vm397_vm2, %v815_v52 }
 0x20e   : > { %v744_v53 = vpop.trf.xlu0  ;;  %v776_v54 = vpop.trf.xlu1 }
 0x20f   : > { %v800_v55 = vadd.f32 %v1346_v18, %v744_v53  ;;  %v816_v56 = vadd.f32 %v1346_v18, %v776_v54 }
 0x211   : > { %1008 = vst.msk [vmem:[%s1153_s6 + $0x248] sm:$0xff] %vm397_vm2, %v800_v55  ;;  %1024 = vst.msk [vmem:[%s1153_s6 + $0x2c8] sm:$0xff] %vm397_vm2, %v816_v56 }
 0x212   : > { %v745_v57 = vpop.trf.xlu0  ;;  %v777_v58 = vpop.trf.xlu1 }
 0x213   : > { %v801_v59 = vadd.f32 %v1346_v18, %v745_v57  ;;  %v817_v60 = vadd.f32 %v1346_v18, %v777_v58 }
 0x215   : > { %1009 = vst.msk [vmem:[%s1153_s6 + $0x250] sm:$0xff] %vm397_vm2, %v801_v59  ;;  %1025 = vst.msk [vmem:[%s1153_s6 + $0x2d0] sm:$0xff] %vm397_vm2, %v817_v60 }
 0x216   : > { %v746_v61 = vpop.trf.xlu0  ;;  %v778_v62 = vpop.trf.xlu1 }
 0x217   : > { %v802_v63 = vadd.f32 %v1346_v18, %v746_v61  ;;  %v818_v0 = vadd.f32 %v1346_v18, %v778_v62 }
 0x219   : > { %1010 = vst.msk [vmem:[%s1153_s6 + $0x258] sm:$0xff] %vm397_vm2, %v802_v63  ;;  %1026 = vst.msk [vmem:[%s1153_s6 + $0x2d8] sm:$0xff] %vm397_vm2, %v818_v0 }
 0x21a   : > { %v747_v1 = vpop.trf.xlu0  ;;  %v779_v2 = vpop.trf.xlu1 }
 0x21b   : > { %v803_v3 = vadd.f32 %v1346_v18, %v747_v1  ;;  %v819_v4 = vadd.f32 %v1346_v18, %v779_v2 }
 0x21d   : > { %1011 = vst.msk [vmem:[%s1153_s6 + $0x260] sm:$0xff] %vm397_vm2, %v803_v3  ;;  %1027 = vst.msk [vmem:[%s1153_s6 + $0x2e0] sm:$0xff] %vm397_vm2, %v819_v4 }
 0x21e   : > { %v748_v5 = vpop.trf.xlu0  ;;  %v780_v6 = vpop.trf.xlu1 }
 0x21f   : > { %v804_v7 = vadd.f32 %v1346_v18, %v748_v5  ;;  %v820_v8 = vadd.f32 %v1346_v18, %v780_v6 }
 0x221   : > { %1012 = vst.msk [vmem:[%s1153_s6 + $0x268] sm:$0xff] %vm397_vm2, %v804_v7  ;;  %1028 = vst.msk [vmem:[%s1153_s6 + $0x2e8] sm:$0xff] %vm397_vm2, %v820_v8 }
 0x222   : > { %v749_v9 = vpop.trf.xlu0  ;;  %v781_v10 = vpop.trf.xlu1 }
 0x223   : > { %v805_v11 = vadd.f32 %v1346_v18, %v749_v9  ;;  %v821_v14 = vadd.f32 %v1346_v18, %v781_v10 }
 0x225   : > { %1013 = vst.msk [vmem:[%s1153_s6 + $0x270] sm:$0xff] %vm397_vm2, %v805_v11  ;;  %1029 = vst.msk [vmem:[%s1153_s6 + $0x2f0] sm:$0xff] %vm397_vm2, %v821_v14 }
 0x226   : > { %v750_v15 = vpop.trf.xlu0  ;;  %v782_v16 = vpop.trf.xlu1 }
 0x227   : > { %v806_v17 = vadd.f32 %v1346_v18, %v750_v15  ;;  %v822_v19 = vadd.f32 %v1346_v18, %v782_v16 }
 0x229   : > { %1014 = vst.msk [vmem:[%s1153_s6 + $0x278] sm:$0xff] %vm397_vm2, %v806_v17  ;;  %1030 = vst.msk [vmem:[%s1153_s6 + $0x2f8] sm:$0xff] %vm397_vm2, %v822_v19 }
 0x22a PF: > { %s13_s14 = sadd.s32 1, %s1083_s14   ;;  %s1461_s12 = smov %s1079_s13 }
 0x22b   : > { %p10_p5 = scmp.ge.s32.totalorder %s13_s14, 4   ;;  %s1462_s13 = smov %s1464_s15 }
 0x22d   :  { %12 = sbr.rel (!%p10_p5) target bundleno = 2 (0x2), region = 68 }

</bundles_post_ra>
